<compile_context>
chip_gen: v6e
topology: v6e:2x2x1
jax: 0.10.0
libtpu: 0.0.40
codegen_flags: <defaults>
</compile_context>

<pallas_src>
import functools

import jax
import jax.numpy as jnp
from jax.experimental import pallas as pl
from jax.experimental.pallas import tpu as pltpu


_LANE = 128


def _round_up(x, m):
    return (x + m - 1) // m * m


def _largest_divisor_leq(n, cap):
    cap = max(1, min(n, int(cap)))
    for d in range(cap, 0, -1):
        if n % d == 0:
            return d
    return 1


def _hw_config():
    """Generation-aware VMEM budgets.

    v5e/v6e: 128-MiB VMEM, single TensorCore.  v7x: 64-MiB VMEM per TC, 2 TCs.
    Returns (vmem_limit_bytes, fused_block_limit, tiled_target_block, two_tc).
    """
    vmem_cap = 64 * 1024 * 1024                      # conservative fallback
    try:
        info = pltpu.get_tpu_info()
        vmem_cap = int(getattr(info, "vmem_capacity_bytes", vmem_cap))
    except Exception:
        pass
    two_tc = vmem_cap < 100 * 1024 * 1024            # v7x-class: 64 MiB per TC
    if vmem_cap >= 128 * 1024 * 1024:                # v5e / v6e
        vmem_limit = 96 * 1024 * 1024
        fused_limit = 20 * 1024 * 1024               # per-step block; pipeline ~4x
        target_block = 2 * 1024 * 1024
    else:                                            # v7x-class (64 MiB per TC)
        vmem_limit = min(48 * 1024 * 1024, (vmem_cap * 3) // 4)
        fused_limit = 10 * 1024 * 1024
        target_block = 4 * 1024 * 1024
    return vmem_limit, fused_limit, target_block, two_tc


def _se_mlp(gap_f32, w1, b1, w2, b2, *, use_mxu):
    """Squeeze-excite MLP.

    gap_f32: (Bn, C) f32.  For small C (< 128) the MLP stays on the VPU/XLU
    (broadcast-multiply + lane reduce) where those slots are otherwise idle;
    for C >= 128 it uses a single MXU matmul (weights are pre-transposed in
    the wrapper: w1 (C, Cr), w2 (Cr, C)).  Returns (Bn, C) f32.
    """
    if use_mxu:
        h = jnp.dot(gap_f32, w1, preferred_element_type=jnp.float32) + b1   # (Bn, Cr)
        h = jnp.maximum(h, 0.0)
        a = jnp.dot(h, w2, preferred_element_type=jnp.float32) + b2         # (Bn, C)
    else:
        # w1: (Cr, C), w2: (C, Cr)
        h = jnp.sum(gap_f32[:, None, :] * w1[None, :, :], axis=-1) + b1     # (Bn, Cr)
        h = jnp.maximum(h, 0.0)
        a = jnp.sum(h[:, None, :] * w2[None, :, :], axis=-1) + b2           # (Bn, C)
    return jax.nn.sigmoid(a)


def _fused_kernel(x_ref, w1_ref, b1_ref, w2_ref, b2_ref, o_ref, *, inv_hw, use_mxu):
    """Single pass: whole (Bn, C, HW) spatial plane resident in VMEM."""
    # f32 accumulation without materializing an f32 copy of the block.
    gap = jnp.sum(x_ref[...], axis=-1, dtype=jnp.float32) * inv_hw          # (Bn, C)
    attn = _se_mlp(gap, w1_ref[...], b1_ref[...], w2_ref[...], b2_ref[...],
                   use_mxu=use_mxu)
    x = x_ref[...]                                      # re-read: short live range
    o_ref[...] = (x * attn.astype(x.dtype)[:, :, None]).astype(o_ref.dtype)


def _gap_attn_kernel(x_ref, w1_ref, b1_ref, w2_ref, b2_ref, attn_ref, *,
                     inv_hw, use_mxu):
    """Tiled phase 1: GAP reduction over HW tiles + SE-MLP finalize.

    Grid = (batch_blocks, hw_blocks); the hw axis is the reduction
    ("arbitrary").  attn_ref's block index is constant along hw, so it stays
    resident in VMEM and doubles as the f32 partial-sum accumulator.
    """
    k = pl.program_id(1)

    @pl.when(k == 0)
    def _init():
        attn_ref[...] = jnp.zeros_like(attn_ref)

    part = jnp.sum(x_ref[...], axis=-1, dtype=jnp.float32)                  # (Bn, C)
    attn_ref[...] += part[:, :, None]

    @pl.when(k == pl.num_programs(1) - 1)
    def _finalize():
        gap = attn_ref[...][:, :, 0] * inv_hw                               # (Bn, C)
        attn = _se_mlp(gap, w1_ref[...], b1_ref[...], w2_ref[...], b2_ref[...],
                       use_mxu=use_mxu)
        attn_ref[...] = attn[:, :, None]


def _apply_kernel(x_ref, attn_ref, o_ref):
    """Tiled phase 2: out = x * attn (lane-dense tiles)."""
    x = x_ref[...]                                                          # (Bn, C, T)
    a = attn_ref[...].astype(x.dtype)                                       # (Bn, C, 1)
    o_ref[...] = (x * a).astype(o_ref.dtype)


def channel_attention(x, w1, b1, w2, b2, *, batch_block=None, hw_tile=None,
                      force_tiled=False):
    """SE channel attention: out = sigmoid(W2 . relu(W1 . GAP(x) + b1) + b2) * x.

    x: (N, C, H, W). w1: (C//r, C), b1: (C//r,), w2: (C, C//r), b2: (C,).
    """
    N, C, H, W = x.shape
    Cr = w1.shape[0]
    HW = H * W
    esize = jnp.dtype(x.dtype).itemsize
    inv_hw = 1.0 / float(HW)

    vmem_limit, fused_limit, target_block, two_tc = _hw_config()

    # MLP params: 2-D f32 (negligible size; keep the MLP exact even for bf16 x).
    use_mxu = C >= 128
    if use_mxu:
        w1k = jnp.transpose(w1.astype(jnp.float32))      # (C, Cr)
        w2k = jnp.transpose(w2.astype(jnp.float32))      # (Cr, C)
    else:
        w1k = w1.astype(jnp.float32)                     # (Cr, C)
        w2k = w2.astype(jnp.float32)                     # (C, Cr)
    b1k = b1.reshape(1, Cr).astype(jnp.float32)
    b2k = b2.reshape(1, C).astype(jnp.float32)
    w1_shape, w2_shape = w1k.shape, w2k.shape

    mlp_flops = 4 * N * C * Cr

    # Per-image VMEM footprint of one buffered plane (layout-padded estimate).
    c_pad = _round_up(C, 8)
    hw_lane_pad = _round_up(HW, _LANE)
    plane_vmem_bytes = c_pad * hw_lane_pad * esize

    use_fused = (not force_tiled) and plane_vmem_bytes <= fused_limit
    # On a 2-TC chip a single-image fused call would run on one core with no
    # pipelining; prefer the HW-parallel tiled path for big single-image planes.
    if use_fused and two_tc and N == 1 and plane_vmem_bytes >= 4 * 1024 * 1024:
        use_fused = False

    if use_fused:
        # ---------------- fused single-pass path ----------------
        if batch_block is None:
            cap = max(1, fused_limit // max(plane_vmem_bytes, 1))
            if two_tc and N > 1:
                cap = min(cap, max(1, N // 2))    # both TensorCores get work
            batch_block = _largest_divisor_leq(N, cap)
        bn = batch_block
        assert N % bn == 0, "batch_block must divide N"
        nb = N // bn

        # No pad, no slice: block last two dims equal the full array extents,
        # which is exempt from the (8, 128) divisibility rule.
        x_flat = x.reshape(N, C, HW)

        out_flat = pl.pallas_call(
            functools.partial(_fused_kernel, inv_hw=inv_hw, use_mxu=use_mxu),
            out_shape=jax.ShapeDtypeStruct((N, C, HW), x.dtype),
            grid_spec=pltpu.PrefetchScalarGridSpec(
                num_scalar_prefetch=0,
                grid=(nb,),
                in_specs=[
                    pl.BlockSpec((bn, C, HW), lambda b: (b, 0, 0)),
                    pl.BlockSpec(w1_shape, lambda b: (0, 0)),
                    pl.BlockSpec((1, Cr), lambda b: (0, 0)),
                    pl.BlockSpec(w2_shape, lambda b: (0, 0)),
                    pl.BlockSpec((1, C), lambda b: (0, 0)),
                ],
                out_specs=pl.BlockSpec((bn, C, HW), lambda b: (b, 0, 0)),
            ),
            compiler_params=pltpu.CompilerParams(
                dimension_semantics=("parallel",),
                vmem_limit_bytes=vmem_limit),
            cost_estimate=pl.CostEstimate(
                flops=int(2 * N * C * HW + mlp_flops),
                transcendentals=int(N * C),
                bytes_accessed=int(2 * N * C * HW * esize)),
        )(x_flat, w1k, b1k, w2k, b2k)

        return out_flat.reshape(N, C, H, W)

    # ---------------- two-phase HW-tiled path (planes too big for VMEM) ----------------
    hw_pad = hw_lane_pad                    # pad only to the next multiple of 128
    n_lg = hw_pad // _LANE                  # number of 128-lane groups

    if hw_tile is None:
        # Phase-2 tile (4 buffered blocks live: 2 in + 2 out).
        cap_lg2 = max(1, target_block // max(c_pad * _LANE * esize, 1))
        tile2 = _largest_divisor_leq(n_lg, cap_lg2) * _LANE
        # Phase-1 tile can be ~2x larger: its (Bn, C, 1) output is resident,
        # so only 2 input buffers are live.
        cap_lg1 = max(1, (2 * target_block) // max(c_pad * _LANE * esize, 1))
        tile1 = _largest_divisor_leq(n_lg, cap_lg1) * _LANE
    else:
        hw_tile = min(int(hw_tile), hw_pad)
        assert hw_tile % _LANE == 0, "hw_tile must be a multiple of 128"
        assert hw_pad % hw_tile == 0, "hw_tile must divide round_up(H*W, 128)"
        tile1 = tile2 = hw_tile

    if batch_block is None:
        cap = max(1, target_block // max(c_pad * tile2 * esize, 1))
        if two_tc and N > 1:
            cap = min(cap, max(1, N // 2))
        batch_block = _largest_divisor_leq(N, cap)
    bn = batch_block
    assert N % bn == 0, "batch_block must divide N"
    nb = N // bn
    nhw1 = hw_pad // tile1
    nhw2 = hw_pad // tile2

    x_flat = x.reshape(N, C, HW)
    if hw_pad != HW:
        # TODO(synk): bounded (<128-column) zero pad; could be replaced by
        # in-kernel tail masking if unaligned large planes ever dominate.
        x_flat = jnp.pad(x_flat, ((0, 0), (0, 0), (0, hw_pad - HW)))

    # Phase 1: per-(batch, channel) attention vector (GAP reduction + SE-MLP).
    attn = pl.pallas_call(
        functools.partial(_gap_attn_kernel, inv_hw=inv_hw, use_mxu=use_mxu),
        out_shape=jax.ShapeDtypeStruct((N, C, 1), jnp.float32),
        grid_spec=pltpu.PrefetchScalarGridSpec(
            num_scalar_prefetch=0,
            grid=(nb, nhw1),
            in_specs=[
                pl.BlockSpec((bn, C, tile1), lambda b, k: (b, 0, k)),
                pl.BlockSpec(w1_shape, lambda b, k: (0, 0)),
                pl.BlockSpec((1, Cr), lambda b, k: (0, 0)),
                pl.BlockSpec(w2_shape, lambda b, k: (0, 0)),
                pl.BlockSpec((1, C), lambda b, k: (0, 0)),
            ],
            out_specs=pl.BlockSpec((bn, C, 1), lambda b, k: (b, 0, 0)),
        ),
        compiler_params=pltpu.CompilerParams(
            dimension_semantics=("parallel", "arbitrary"),
            vmem_limit_bytes=vmem_limit),
        cost_estimate=pl.CostEstimate(
            flops=int(N * C * hw_pad + mlp_flops),
            transcendentals=int(N * C),
            bytes_accessed=int(N * C * hw_pad * esize)),
    )(x_flat, w1k, b1k, w2k, b2k)

    # Phase 2: out = x * attn with lane-dense tiles.
    out_flat = pl.pallas_call(
        _apply_kernel,
        out_shape=jax.ShapeDtypeStruct((N, C, hw_pad), x.dtype),
        grid_spec=pltpu.PrefetchScalarGridSpec(
            num_scalar_prefetch=0,
            grid=(nb, nhw2),
            in_specs=[
                pl.BlockSpec((bn, C, tile2), lambda b, k: (b, 0, k)),
                pl.BlockSpec((bn, C, 1), lambda b, k: (b, 0, 0)),
            ],
            out_specs=pl.BlockSpec((bn, C, tile2), lambda b, k: (b, 0, k)),
        ),
        compiler_params=pltpu.CompilerParams(
            dimension_semantics=("parallel", "parallel"),
            vmem_limit_bytes=vmem_limit),
        cost_estimate=pl.CostEstimate(
            flops=int(N * C * hw_pad),
            transcendentals=0,
            bytes_accessed=int(2 * N * C * hw_pad * esize)),
    )(x_flat, attn)

    if hw_pad != HW:
        out_flat = out_flat[:, :, :HW]
    return out_flat.reshape(N, C, H, W)


def channel_attention_ref(x, w1, b1, w2, b2):
    """Pure-JAX reference matching the PyTorch forward."""
    gap = jnp.mean(x, axis=(2, 3), keepdims=True)                        # (N,C,1,1)
    h = jnp.einsum('oc,ncij->noij', w1, gap) + b1[None, :, None, None]   # (N,Cr,1,1)
    h = jnp.maximum(h, 0.0)
    a = jnp.einsum('oc,ncij->noij', w2, h) + b2[None, :, None, None]     # (N,C,1,1)
    a = jax.nn.sigmoid(a)
    return a * x


if __name__ == "__main__":
    # Small shapes consistent with the module: in_channels=16, reduction=8.
    N, C, H, W = 2, 16, 16, 16
    reduction = 8
    Cr = C // reduction

    key = jax.random.PRNGKey(0)
    kx, k1, k2, k3, k4, kx2 = jax.random.split(key, 6)

    x = jax.random.normal(kx, (N, C, H, W), dtype=jnp.float32)
    # Deterministic synthetic parameters (shapes from __init__).
    w1 = jax.random.normal(k1, (Cr, C), dtype=jnp.float32) * (1.0 / jnp.sqrt(C))
    b1 = jax.random.normal(k2, (Cr,), dtype=jnp.float32) * 0.1
    w2 = jax.random.normal(k3, (C, Cr), dtype=jnp.float32) * (1.0 / jnp.sqrt(Cr))
    b2 = jax.random.normal(k4, (C,), dtype=jnp.float32) * 0.1

    ref = channel_attention_ref(x, w1, b1, w2, b2)

    # Fused single-pass path (default for small/medium planes).
    out = jax.block_until_ready(channel_attention(x, w1, b1, w2, b2))
    assert out.shape == (N, C, H, W)
    assert jnp.allclose(out, ref, atol=1e-5, rtol=1e-5), "fused path mismatch"

    # Fused path with >1 image per grid step (batched GAP + batched SE-MLP).
    out_b = jax.block_until_ready(
        channel_attention(x, w1, b1, w2, b2, batch_block=2))
    assert jnp.allclose(out_b, ref, atol=1e-5, rtol=1e-5), "batched path mismatch"

    # Fused path with HW not a multiple of 128 (no pad/slice; masked tail stores).
    H2 = W2 = 15
    x_odd = jax.random.normal(kx2, (N, C, H2, W2), dtype=jnp.float32)
    ref_odd = channel_attention_ref(x_odd, w1, b1, w2, b2)
    out_odd = jax.block_until_ready(channel_attention(x_odd, w1, b1, w2, b2))
    assert jnp.allclose(out_odd, ref_odd, atol=1e-5, rtol=1e-5), "odd-HW mismatch"

    # Two-phase HW-tiled path (used automatically for planes too big for VMEM).
    out_t = jax.block_until_ready(
        channel_attention(x, w1, b1, w2, b2, force_tiled=True, hw_tile=128))
    assert jnp.allclose(out_t, ref, atol=1e-5, rtol=1e-5), "tiled path mismatch"

    print("KERNEL_OK")
</pallas_src>

<mosaic_0001>
module attributes {stable_mosaic.version = 11 : i64} {
  func.func @_fused_kernel(%arg0: i32, %arg1: memref<1x16x256xf32, #tpu.memory_space<vmem>>, %arg2: memref<2x16xf32, #tpu.memory_space<vmem>>, %arg3: memref<1x2xf32, #tpu.memory_space<vmem>>, %arg4: memref<16x2xf32, #tpu.memory_space<vmem>>, %arg5: memref<1x16xf32, #tpu.memory_space<vmem>>, %arg6: memref<1x16x256xf32, #tpu.memory_space<vmem>>) attributes {dimension_semantics = [#tpu.dimension_semantics<parallel>], iteration_bounds = array<i64: 2>, scalar_prefetch = 0 : i64, scratch_operands = 0 : i64, tpu.core_type = #tpu.core_type<tc>, window_params = [{transform_indices = @transform_0, window_bounds = array<i64: 1, 16, 256>}, {pipeline_mode = #tpu.pipeline_mode<synchronous>, transform_indices = @transform_1, window_bounds = array<i64: 2, 16>}, {pipeline_mode = #tpu.pipeline_mode<synchronous>, transform_indices = @transform_2, window_bounds = array<i64: 1, 2>}, {pipeline_mode = #tpu.pipeline_mode<synchronous>, transform_indices = @transform_3, window_bounds = array<i64: 16, 2>}, {pipeline_mode = #tpu.pipeline_mode<synchronous>, transform_indices = @transform_4, window_bounds = array<i64: 1, 16>}, {transform_indices = @transform_5, window_bounds = array<i64: 1, 16, 256>}]} {
    %c0 = arith.constant 0 : index
    %c0_0 = arith.constant 0 : index
    %c0_1 = arith.constant 0 : index
    %0 = vector.load %arg1[%c0, %c0_0, %c0_1] : memref<1x16x256xf32, #tpu.memory_space<vmem>>, vector<1x16x256xf32>
    %cst = arith.constant dense<0.000000e+00> : vector<1x16xf32>
    %1 = vector.multi_reduction <add>, %0, %cst [2] : vector<1x16x256xf32> to vector<1x16xf32>
    %cst_2 = arith.constant 3.906250e-03 : f32
    %2 = vector.broadcast %cst_2 : f32 to vector<1x16xf32>
    %3 = arith.mulf %1, %2 : vector<1x16xf32>
    %c0_3 = arith.constant 0 : index
    %c0_4 = arith.constant 0 : index
    %4 = vector.load %arg2[%c0_3, %c0_4] : memref<2x16xf32, #tpu.memory_space<vmem>>, vector<2x16xf32>
    %c0_5 = arith.constant 0 : index
    %c0_6 = arith.constant 0 : index
    %5 = vector.load %arg3[%c0_5, %c0_6] : memref<1x2xf32, #tpu.memory_space<vmem>>, vector<1x2xf32>
    %c0_7 = arith.constant 0 : index
    %c0_8 = arith.constant 0 : index
    %6 = vector.load %arg4[%c0_7, %c0_8] : memref<16x2xf32, #tpu.memory_space<vmem>>, vector<16x2xf32>
    %c0_9 = arith.constant 0 : index
    %c0_10 = arith.constant 0 : index
    %7 = vector.load %arg5[%c0_9, %c0_10] : memref<1x16xf32, #tpu.memory_space<vmem>>, vector<1x16xf32>
    %8 = vector.shape_cast %3 : vector<1x16xf32> to vector<1x1x16xf32>
    %9 = vector.shape_cast %4 : vector<2x16xf32> to vector<1x2x16xf32>
    %10 = vector.broadcast %8 : vector<1x1x16xf32> to vector<1x2x16xf32>
    %11 = arith.mulf %10, %9 : vector<1x2x16xf32>
    %cst_11 = arith.constant dense<0.000000e+00> : vector<1x2xf32>
    %12 = vector.multi_reduction <add>, %11, %cst_11 [2] : vector<1x2x16xf32> to vector<1x2xf32>
    %13 = arith.addf %12, %5 : vector<1x2xf32>
    %cst_12 = arith.constant 0.000000e+00 : f32
    %14 = vector.broadcast %cst_12 : f32 to vector<1x2xf32>
    %15 = arith.maximumf %13, %14 : vector<1x2xf32>
    %16 = vector.shape_cast %15 : vector<1x2xf32> to vector<1x1x2xf32>
    %17 = vector.shape_cast %6 : vector<16x2xf32> to vector<1x16x2xf32>
    %18 = vector.broadcast %16 : vector<1x1x2xf32> to vector<1x16x2xf32>
    %19 = arith.mulf %18, %17 : vector<1x16x2xf32>
    %cst_13 = arith.constant dense<0.000000e+00> : vector<1x16xf32>
    %20 = vector.multi_reduction <add>, %19, %cst_13 [2] : vector<1x16x2xf32> to vector<1x16xf32>
    %21 = arith.addf %20, %7 : vector<1x16xf32>
    %22 = arith.negf %21 : vector<1x16xf32>
    %23 = math.exp %22 : vector<1x16xf32>
    %cst_14 = arith.constant 1.000000e+00 : f32
    %24 = vector.broadcast %cst_14 : f32 to vector<1x16xf32>
    %25 = arith.addf %24, %23 : vector<1x16xf32>
    %26 = arith.divf %24, %25 : vector<1x16xf32>
    %c0_15 = arith.constant 0 : index
    %c0_16 = arith.constant 0 : index
    %c0_17 = arith.constant 0 : index
    %27 = vector.load %arg1[%c0_15, %c0_16, %c0_17] : memref<1x16x256xf32, #tpu.memory_space<vmem>>, vector<1x16x256xf32>
    %28 = vector.shape_cast %26 : vector<1x16xf32> to vector<1x16x1xf32>
    %29 = vector.broadcast %28 : vector<1x16x1xf32> to vector<1x16x256xf32>
    %30 = arith.mulf %27, %29 : vector<1x16x256xf32>
    %c0_18 = arith.constant 0 : index
    %c0_19 = arith.constant 0 : index
    %c0_20 = arith.constant 0 : index
    %31 = vector.load %arg6[%c0_18, %c0_19, %c0_20] : memref<1x16x256xf32, #tpu.memory_space<vmem>>, vector<1x16x256xf32>
    tpu.vector_store %arg6[%c0_18, %c0_19, %c0_20], %30 {strides = array<i32>} : memref<1x16x256xf32, #tpu.memory_space<vmem>>, vector<1x16x256xf32>,
    return
  }
  func.func @transform_0(%arg0: i32) -> (i32, i32, i32) {
    %c0_i32 = arith.constant 0 : i32
    %c0_i32_0 = arith.constant 0 : i32
    %c0_i32_1 = arith.constant 0 : i32
    return %arg0, %c0_i32, %c0_i32_0 : i32, i32, i32
  }
  func.func @transform_1(%arg0: i32) -> (i32, i32) {
    %c0_i32 = arith.constant 0 : i32
    %c0_i32_0 = arith.constant 0 : i32
    %c0_i32_1 = arith.constant 0 : i32
    return %c0_i32, %c0_i32_0 : i32, i32
  }
  func.func @transform_2(%arg0: i32) -> (i32, i32) {
    %c0_i32 = arith.constant 0 : i32
    %c0_i32_0 = arith.constant 0 : i32
    %c0_i32_1 = arith.constant 0 : i32
    return %c0_i32, %c0_i32_0 : i32, i32
  }
  func.func @transform_3(%arg0: i32) -> (i32, i32) {
    %c0_i32 = arith.constant 0 : i32
    %c0_i32_0 = arith.constant 0 : i32
    %c0_i32_1 = arith.constant 0 : i32
    return %c0_i32, %c0_i32_0 : i32, i32
  }
  func.func @transform_4(%arg0: i32) -> (i32, i32) {
    %c0_i32 = arith.constant 0 : i32
    %c0_i32_0 = arith.constant 0 : i32
    %c0_i32_1 = arith.constant 0 : i32
    return %c0_i32, %c0_i32_0 : i32, i32
  }
  func.func @transform_5(%arg0: i32) -> (i32, i32, i32) {
    %c0_i32 = arith.constant 0 : i32
    %c0_i32_0 = arith.constant 0 : i32
    %c0_i32_1 = arith.constant 0 : i32
    return %arg0, %c0_i32, %c0_i32_0 : i32, i32, i32
  }
}

</mosaic_0001>

<bundles_post_ra>
// kernel: tpu_custom_call.1
= control target key start
LH: loop header
LB: loop body
LE: loop exit
PB: predicated region body
PF: predicated region fallthrough
CT: control target
= control target key end

     0   :  { %10 = vsyncpa [#allocation3], 0  ;;  %s1239_s0 = inlined_call_operand.hbm [shape: f32[2,16,256], index: 0, kind: input, shape index: {}]   ;;  %s1240_s1 = inlined_call_operand.vmem [shape: f32[2,16], index: 1, kind: input, shape index: {}]   ;;  %s1241_s2 = inlined_call_operand.vmem [shape: f32[1,2], index: 2, kind: input, shape index: {}]   ;;  %s1242_s3 = inlined_call_operand.vmem [shape: f32[16,2], index: 3, kind: input, shape index: {}]   ;;  %s1243_s4 = inlined_call_operand.vmem [shape: f32[1,16], index: 4, kind: input, shape index: {}]   ;;  %s1244_s5 = inlined_call_operand.hbm [shape: f32[2,16,256], index: 5, kind: output, shape index: {}]  }
   0x1   :  { %12 = vsyncpa [#allocation3 + $0x1], 0 }
   0x2   :  { %13 = vsyncpa [#allocation4], 0 }
   0x3   :  { %15 = vsyncpa [#allocation4 + $0x1], 0  ;;  %s995_s18 = smov 0   ;;  %s997_s19 = smov 0  }
   0x4   :  { %s999_s20 = smov 0   ;;  %s1001_s21 = smov 0  }
   0x5 LB: > { %s1016_s22 = sadd.s32 4294967295, %s956_s21   ;;  %s783_s23 = sadd.s32 4294967294, %s956_s21   ;;  %s956_s21 = sphi %s1001_s21, %s1259_s21   ;;  %s952_s20 = sphi %s999_s20, %s1258_s20   ;;  %s948_s19 = sphi %s997_s19, %s1257_s19   ;;  %s944_s18 = sphi %s995_s18, %s1256_s18  }
   0x6   : > { %s1020_s24 = sadd.s32 1, %s956_s21   ;;  %s28_s25 = sadd.s32 1, %s952_s20 }
   0x7   : > { %s25_s26 = ssub.s32 %s956_s21, %s1020_s24  ;;  %p35_p0 = scmp.ne.s32.totalorder %s952_s20, %s948_s19 }
   0x8   : > { %p26_p1 = scmp.eq.s32.totalorder %s25_s26, 0  ;;  %p36_p2 = scmp.eq.s32.totalorder %s956_s21, 0 }
   0x9   : > { %p41_p3 = scmp.ne.s32.totalorder %s948_s19, %s944_s18  ;;  %p42_p4 = scmp.eq.s32.totalorder %s1016_s22, 0 }
   0xa   : > { %s1032_s27 = scalar_select %p26_p1, %s952_s20, %s28_s25  }
   0xb   : > { %p1034_p5 = por %p36_p2, %p35_p0  ;;  %p1038_p6 = por %p42_p4, %p41_p3 }
   0xc   : > { %p149_p7 = scmp.eq.s32.totalorder %s1016_s22, 1  ;;  %p155_p8 = scmp.eq.s32.totalorder %s783_s23, 1 }
   0xd   : > { %s1248_s29 = scalar_select %p1038_p6, 1, 0 }
   0xe   : > { %p815_p10 = scmp.lt.s32.totalorder %s956_s21, 2  ;;  %p1045_p11 = por %p149_p7, %p35_p0 }
   0xf   : > { %p1049_p12 = por %p155_p8, %p41_p3  ;;  %s187_s7 = sand.u32 1, %s952_s20  }
  0x10   : > { %s1249_s30 = scalar_select %p1045_p11, 1, 0 }
  0x11   : > { %s1250_s6 = scalar_select %p1049_p12, 1, 0 }
  0x12   : > { %s801_s8 = sshll.u32 %s956_s21, 9  ;;  %s786_s9 = sshll.u32 %s187_s7, 5 }
  0x13   : > { %s1058_s12 = scalar_lea.hbm %s1239_s0, %s801_s8  ;;  %s191_s13 = scalar_lea.vmem [#allocation2], %s786_s9 }
  0x14   : > { %s198_s14 = sshll.u32 %s191_s13, 4  ;;  %p1062_p13 = pnand %p815_p10, %p1034_p5  ;;  %s1066_s14 = int_to_ptr.vmem [resolvable:$true] %s198_s14 }
  0x15   : > { %s1068_s16 = scalar_lea.sflag [#allocation3], %s187_s7  ;;  %s864_s17 = scalar_lea.hbm %s1058_s12, 512 }
  0x16   : > { %p865_p0 = scmp.ne.s32.totalorder %s1058_s12, %s864_s17  ;;  %p866_p1 = pneg %p1062_p13 }
  0x17   : > { %s869_s26 = scalar_lea.hbm %s1239_s0, 1024  ;;  %p870_p4 = scmp.lt.s32.totalorder %s1058_s12, %s1239_s0 }
  0x18   : > { %p867_p2 = pnand %p866_p1, %p865_p0  ;;  %p871_p5 = scmp.lt.s32.totalorder %s869_s26, %s864_s17 }
  0x1a   : > { %p868_p3 = pneg %p867_p2  ;;  %p872_p7 = por %p871_p5, %p870_p4 }
  0x1c   : > { %p873_p8 = pnand %p872_p7, %p868_p3 }
  0x1e   : > { %876 = shalt.err (!%p873_p8)
}
  0x1f   : > { %s877_s7 = scalar_lea.vmem %s1066_s14, 512  ;;  %s958_s9 = smov [#allocation2]  }
  0x20   : > { %p878_p10 = scmp.ne.s32.totalorder %s1066_s14, %s877_s7  ;;  %s882_s10 = sshll.u32 %s958_s9, 4  ;;  %s883_s10 = int_to_ptr.vmem [resolvable:$false] %s882_s10 }
  0x21   : > { %s884_s11 = scalar_lea.vmem %s883_s10, 1024  ;;  %p885_p2 = scmp.lt.s32.totalorder %s1066_s14, %s883_s10 }
  0x22   : > { %p880_p9 = pnand %p878_p10, %p866_p1  ;;  %p886_p12 = scmp.lt.s32.totalorder %s884_s11, %s877_s7 }
  0x24   : > { %p881_p0 = pneg %p880_p9  ;;  %p887_p11 = por %p886_p12, %p885_p2 }
  0x26   : > { %p888_p6 = pnand %p887_p11, %p881_p0 }
  0x28   : > { %891 = shalt.err (!%p888_p6)
}
  0x29   : > { %s959_s13 = smov 256   ;;  %s960_s17 = smov 16  }
  0x2a   : > { %810 = dma.hbm_to_vmem [thread:$0]  (!%p1062_p13), %s1058_s12, 512, %s1066_s14, %s1068_s16, %s959_s13, %s959_s13, %s960_s17  }
  0x2b   : > { %p789_p9 = scmp.ge.s32.totalorder %s956_s21, 1  ;;  %p206_p1 = scmp.lt.s32.totalorder %s956_s21, 3 }
  0x2d   : > { %p207_p3 = pnand %p789_p9, %p206_p1 }
  0x2e   : > { %s1092_s23 = sand.u32 (!%p207_p3), 1, %s948_s19   ;;  %p1252_p6 = scmp.ne.s32.totalorder (!%p207_p3), %s1248_s29, 0 }
  0x2f   : > { %210 = sbr.rel (%p207_p3) target bundleno = 956 (0x3bc), region = 40  ;;  %s790_s25 = sshll.u32 (!%p207_p3), %s1092_s23, 5 }
  0x30   : > { %s213_s26 = scalar_lea.sflag (!%p207_p3), [#allocation3], %s1092_s23  ;;  %s216_s28 = scalar_lea.vmem (!%p207_p3), [#allocation2], %s790_s25 }
  0x34   : > { %935 = dma.done.wait (%p1252_p6), %s213_s26, 512  }
  0x35   : > { %937 = vsyncadd (%p1252_p6), %s213_s26, 4294966784  ;;  %v261_v0 = vlaneseq  ;;  %v1106_v3 = vld [vmem:[%s216_s28] sm:$0xff]  ;;  %v1108_v4 = vld [vmem:[%s216_s28 + $0x8] sm:$0xff]  ;;  %v961_v13 = vmov 0   ;;  %vm318_vm0 = vcmask 130112   ;;  %vm329_vm1 = vcmask 1041409  }
  0x36   : > { %v1110_v5 = vld [vmem:[%s216_s28 + $0x10] sm:$0xff]  ;;  %v247_v6 = vadd.f32 %v1108_v4, %v1106_v3  ;;  %v1114_v7 = vld [vmem:[%s216_s28 + $0x18] sm:$0xff]  ;;  %v255_v8 = vld [vmem:[%s1240_s1] sm:$0x3]  ;;  %854 = vset.pattern.permute.xlu1 %v961_v13  ;;  %855 = vset.pattern.permute.xlu0 %v961_v13  ;;  %vm332_vm2 = vcmask 123904   ;;  %vm622_vm3 = vcmask 1042434  }
  0x37   : > { %v1103_v1 = vshrl.u32 %v261_v0, 7  ;;  %v250_v10 = vadd.f32 %v1114_v7, %v1110_v5  ;;  %v257_v14 = vld [vmem:[%s1242_s3] sm:$0xff]  ;;  %v1131_v21 = vld [vmem:[%s1242_s3 + $0x8] sm:$0xff]  ;;  %v308_v51 = vand.u32 127, %v261_v0  ;;  %vm624_vm4 = vcmask 1043459   ;;  %s242_s13 = scalar_lea.vmem [#allocation5], %s790_s25 }
  0x38   : > { %248 = vadd.xlane.f32.xlu0 %v247_v6  ;;  %v792_v15 = vld [vmem:[%s1241_s2] ss:$0 sm:$0xff]  ;;  %vm626_vm5 = vcmask 1044484   ;;  %vm628_vm6 = vcmask 1045509   ;;  %vm630_vm7 = vcmask 1046534   ;;  %vm632_vm8 = vcmask 1047559  }
  0x39   : > { %v263_v2 = vsub.s32 0, %v1103_v1  ;;  %v274_v11 = vsub.s32 1, %v1103_v1  ;;  %v365_v30 = vsub.s32 2, %v1103_v1  ;;  %v379_v34 = vsub.s32 4, %v1103_v1  ;;  %s710_s17 = sshll.u32 %s242_s13, 4  ;;  %s802_s26 = sshll.u32 %s1016_s22, 9  ;;  %s1187_s17 = int_to_ptr.vmem [resolvable:$true] %s710_s17 }
  0x3a   : > { %v393_v38 = vsub.s32 6, %v1103_v1  ;;  %v372_v39 = vsub.s32 3, %v1103_v1  ;;  %v386_v44 = vsub.s32 5, %v1103_v1  ;;  %v400_v48 = vsub.s32 7, %v1103_v1  ;;  %s1194_s29 = scalar_lea.hbm %s1244_s5, %s802_s26  ;;  %s697_s22 = scalar_lea.sflag [#allocation4], %s1092_s23 }
  0x3b   : > { %v264_v9 = vrot.slane %v255_v8, %v263_v2  ;;  %v275_v12 = vrot.slane %v255_v8, %v274_v11  ;;  %v352_v16 = vrot.slane %v257_v14, %v263_v2  ;;  %v359_v17 = vrot.slane %v257_v14, %v274_v11  ;;  %s892_s25 = scalar_lea.vmem %s1187_s17, 512  ;;  %p1253_p12 = scmp.ne.s32.totalorder %s1249_s30, 0 }
  0x3c   : > { %251 = vadd.xlane.f32.xlu0 %v250_v10  ;;  %v408_v23 = vrot.slane %v1131_v21, %v263_v2  ;;  %v415_v28 = vrot.slane %v1131_v21, %v274_v11  ;;  %v366_v32 = vrot.slane %v257_v14, %v365_v30  ;;  %v422_v35 = vrot.slane %v1131_v21, %v365_v30  ;;  %p893_p11 = scmp.ne.s32.totalorder %s1187_s17, %s892_s25  ;;  %s962_s14 = smov [#allocation5]  }
  0x3d   : > { %266 = vbcast.lane.b32.xlu1 %v264_v9, 256  ;;  %v380_v37 = vrot.slane %v257_v14, %v379_v34  ;;  %v373_v40 = vrot.slane %v257_v14, %v372_v39  ;;  %v450_v41 = vrot.slane %v1131_v21, %v393_v38  ;;  %v429_v42 = vrot.slane %v1131_v21, %v372_v39  ;;  %s896_s15 = sshll.u32 %s962_s14, 4  ;;  %s897_s15 = int_to_ptr.vmem [resolvable:$false] %s896_s15 }
  0x3e   : > { %v436_v43 = vrot.slane %v1131_v21, %v379_v34  ;;  %v387_v45 = vrot.slane %v257_v14, %v386_v44  ;;  %v443_v46 = vrot.slane %v1131_v21, %v386_v44  ;;  %v394_v47 = vrot.slane %v257_v14, %v393_v38  ;;  %p894_p13 = pnand %p893_p11, %p1253_p12  ;;  %s898_s16 = scalar_lea.vmem %s897_s15, 1024 }
  0x3f   : > { %v401_v49 = vrot.slane %v257_v14, %v400_v48  ;;  %v313_v52 = vadd.s32 4294967288, %v308_v51  ;;  %v1149_v56 = vsub.s32 %v308_v51, %v1103_v1  ;;  %v457_v6 = vrot.slane %v1131_v21, %v400_v48  ;;  %p899_p5 = scmp.lt.s32.totalorder %s1187_s17, %s897_s15  ;;  %p900_p7 = scmp.lt.s32.totalorder %s898_s16, %s892_s25 }
  0x40   : > { %vm643_vm9 = vcmask 15360   ;;  %p895_p4 = pneg %p894_p13 }
  0x41   : > { %270 = vbcast.lane.b32.xlu1 %v264_v9, 264  ;;  %v316_v54 = vsub.s32 %v313_v52, %v1103_v1  ;;  %p901_p8 = por %p900_p7, %p899_p5 }
  0x43   : > { %p902_p10 = pnand %p901_p8, %p895_p4 }
  0x45   : > { %281 = vbcast.lane.b32.xlu1 %v275_v12, 264 }
  0x52   : > { %277 = vbcast.lane.b32.xlu0 %v275_v12, 256 }
  0x56   : > { %342 = vbcast.lane.b32.xlu0 %v792_v15, 256 }
  0x5a   : > { %354 = vbcast.lane.b32.xlu0 %v352_v16, 256 }
  0x5e   : > { %361 = vbcast.lane.b32.xlu0 %v359_v17, 256 }
  0x62   : > { %410 = vbcast.lane.b32.xlu0 %v408_v23, 256 }
  0x66   : > { %417 = vbcast.lane.b32.xlu0 %v415_v28, 256 }
  0x6a   : > { %368 = vbcast.lane.b32.xlu0 %v366_v32, 256 }
  0x6e   : > { %424 = vbcast.lane.b32.xlu0 %v422_v35, 256 }
  0x72   : > { %375 = vbcast.lane.b32.xlu0 %v373_v40, 256 }
  0x76   : > { %431 = vbcast.lane.b32.xlu0 %v429_v42, 256 }
  0x7a   : > { %438 = vbcast.lane.b32.xlu0 %v436_v43, 256 }
  0x7e   : > { %389 = vbcast.lane.b32.xlu0 %v387_v45, 256 }
  0x82   : > { %445 = vbcast.lane.b32.xlu0 %v443_v46, 256 }
  0x86   : > { %396 = vbcast.lane.b32.xlu0 %v394_v47, 256 }
  0x8a   : > { %403 = vbcast.lane.b32.xlu0 %v401_v49, 256 }
  0xaf   : > { %v267_v18 = vpop.permute.xlu1 %266 }
  0xb3   : > { %v271_v26 = vpop.permute.xlu1 %270 }
  0xb7   : > { %v282_v33 = vpop.permute.xlu1 %281 }
  0xc1   : > { %v249_v19 = vpop.xlane.xlu0 %248 }
  0xc2   : > { %v253_v20 = vmul.f32 0.00390625, %v249_v19 }
  0xc4   : > { %v287_v22 = vmul.f32 %v267_v18, %v253_v20 }
  0xc5   : > { %v252_v24 = vpop.xlane.xlu0 %251 }
  0xc6   : > { %v254_v25 = vmul.f32 0.00390625, %v252_v24  ;;  %296 = vperm.xlu1 %854, %v287_v22  }
  0xc8   : > { %v288_v27 = vmul.f32 %v271_v26, %v254_v25  ;;  %v290_v36 = vmul.f32 %v282_v33, %v254_v25 }
  0xc9   : > { %v278_v29 = vpop.permute.xlu0 %277 }
  0xca   : > { %299 = vperm.xlu1 %854, %v288_v27   ;;  %v289_v31 = vmul.f32 %v278_v29, %v253_v20 }
  0xcd   : > { %v343_v1 = vpop.permute.xlu0 %342 }
  0xce   : > { %302 = vperm.xlu1 %854, %v289_v31  }
  0xd1   : > { %v355_v8 = vpop.permute.xlu0 %354 }
  0xd2   : > { %305 = vperm.xlu1 %854, %v290_v36  }
  0xd5   : > { %v362_v9 = vpop.permute.xlu0 %361 }
  0xd6   : > { %382 = vbcast.lane.b32.xlu1 %v380_v37, 256 }
  0xd9   : > { %v411_v10 = vpop.permute.xlu0 %410 }
  0xda   : > { %452 = vbcast.lane.b32.xlu1 %v450_v41, 256 }
  0xdd   : > { %v418_v11 = vpop.permute.xlu0 %417 }
  0xe1   : > { %v369_v12 = vpop.permute.xlu0 %368 }
  0xe5   : > { %v425_v13 = vpop.permute.xlu0 %424 }
  0xe9   : > { %v376_v15 = vpop.permute.xlu0 %375 }
  0xed   : > { %v432_v18 = vpop.permute.xlu0 %431 }
  0xf1   : > { %v439_v24 = vpop.permute.xlu0 %438 }
  0xf5   : > { %v390_v26 = vpop.permute.xlu0 %389 }
  0xf9   : > { %v446_v31 = vpop.permute.xlu0 %445 }
  0xfd   : > { %v397_v34 = vpop.permute.xlu0 %396 }
 0x101   : > { %v404_v40 = vpop.permute.xlu0 %403 }
 0x141   : > { %v297_v50 = vpop.permute.xlu1 %296 }
 0x142   : > { %v312_v59 = vrot.slane %v297_v50, %v1149_v56 }
 0x145   : > { %v300_v53 = vpop.permute.xlu1 %299 }
 0x146   : > { %v317_v57 = vrot.slane %v300_v53, %v316_v54 }
 0x148   : > { %v319_v62 = vsel %vm318_vm0, %v317_v57, %v312_v59 }
 0x149   : > { %v303_v55 = vpop.permute.xlu1 %302 }
 0x14a   : > { %v323_v60 = vrot.slane %v303_v55, %v1149_v56 }
 0x14d   : > { %v306_v58 = vpop.permute.xlu1 %305 }
 0x14e   : > { %v327_v61 = vrot.slane %v306_v58, %v316_v54 }
 0x150   : > { %v328_v63 = vsel %vm318_vm0, %v327_v61, %v323_v60 }
 0x151   : > { %v330_v0 = vsel %vm329_vm1, %v328_v63, %v319_v62  ;;  %v383_v14 = vpop.permute.xlu1 %382 }
 0x152   : > { %v333_v2 = vsel %vm332_vm2, %v330_v0, 0.0 }
 0x153   : > { %334 = vadd.xlane.f32.xlu1 %v333_v2 }
 0x155   : > { %v453_v16 = vpop.permute.xlu1 %452 }
 0x164   : > { %459 = vbcast.lane.b32.xlu1 %v457_v6, 256 }
 0x1dc   : > { %v335_v17 = vpop.xlane.xlu1 %334 }
 0x1dd   : > { %v345_v19 = vadd.f32 %v343_v1, %v335_v17 }
 0x1df   : > { %v346_v20 = vmax.f32 %v345_v19, 0.0 }
 0x1e0   : > { %v460_v39 = vpop.permute.xlu1 %459 }
 0x1e1   : > { %v477_v22 = vmul.f32 %v355_v8, %v346_v20  ;;  %v478_v23 = vmul.f32 %v362_v9, %v346_v20  ;;  %v486_v21 = vmul.f32 %v418_v11, %v346_v20  ;;  %v485_v25 = vmul.f32 %v411_v10, %v346_v20 }
 0x1e2   : > { %v487_v27 = vmul.f32 %v425_v13, %v346_v20  ;;  %v479_v28 = vmul.f32 %v369_v12, %v346_v20  ;;  %v488_v29 = vmul.f32 %v432_v18, %v346_v20  ;;  %v480_v30 = vmul.f32 %v376_v15, %v346_v20 }
 0x1e3   : > { %510 = vperm.xlu0 %855, %v477_v22   ;;  %513 = vperm.xlu1 %854, %v478_v23   ;;  %v489_v32 = vmul.f32 %v439_v24, %v346_v20  ;;  %v481_v33 = vmul.f32 %v383_v14, %v346_v20  ;;  %v490_v35 = vmul.f32 %v446_v31, %v346_v20 }
 0x1e4   : > { %v482_v36 = vmul.f32 %v390_v26, %v346_v20  ;;  %v491_v37 = vmul.f32 %v453_v16, %v346_v20  ;;  %v483_v38 = vmul.f32 %v397_v34, %v346_v20  ;;  %v492_v41 = vmul.f32 %v460_v39, %v346_v20 }
 0x1e5   : > { %v484_v42 = vmul.f32 %v404_v40, %v346_v20 }
 0x1e7   : > { %537 = vperm.xlu0 %855, %v486_v21   ;;  %534 = vperm.xlu1 %854, %v485_v25  }
 0x1eb   : > { %540 = vperm.xlu0 %855, %v487_v27   ;;  %516 = vperm.xlu1 %854, %v479_v28  }
 0x1ef   : > { %543 = vperm.xlu0 %855, %v488_v29   ;;  %519 = vperm.xlu1 %854, %v480_v30  }
 0x1f3   : > { %546 = vperm.xlu0 %855, %v489_v32   ;;  %522 = vperm.xlu1 %854, %v481_v33   ;;  %v793_v32 = vld [vmem:[%s1243_s4] ss:$0 sm:$0xff] }
 0x1f7   : > { %549 = vperm.xlu0 %855, %v490_v35   ;;  %525 = vperm.xlu1 %854, %v482_v36  }
 0x1fb   : > { %552 = vperm.xlu0 %855, %v491_v37   ;;  %528 = vperm.xlu1 %854, %v483_v38  }
 0x1ff   : > { %555 = vperm.xlu0 %855, %v492_v41   ;;  %531 = vperm.xlu1 %854, %v484_v42  }
 0x25e   : > { %v511_v43 = vpop.permute.xlu0 %510  ;;  %v514_v44 = vpop.permute.xlu1 %513 }
 0x25f   : > { %v564_v58 = vrot.slane %v514_v44, %v1149_v56  ;;  %v560_v59 = vrot.slane %v511_v43, %v1149_v56 }
 0x261   : > { %v621_v10 = vsel %vm329_vm1, %v564_v58, %v560_v59 }
 0x262   : > { %v538_v45 = vpop.permute.xlu0 %537  ;;  %v535_v46 = vpop.permute.xlu1 %534 }
 0x263   : > { %v592_v54 = vrot.slane %v535_v46, %v1149_v56  ;;  %v596_v55 = vrot.slane %v538_v45, %v1149_v56 }
 0x265   : > { %v634_v6 = vsel %vm329_vm1, %v596_v55, %v592_v54 }
 0x266   : > { %v541_v47 = vpop.permute.xlu0 %540  ;;  %v517_v48 = vpop.permute.xlu1 %516 }
 0x267   : > { %v600_v60 = vrot.slane %v541_v47, %v1149_v56  ;;  %v568_v61 = vrot.slane %v517_v48, %v1149_v56 }
 0x269   : > { %v635_v11 = vsel %vm622_vm3, %v600_v60, %v634_v6  ;;  %v623_v14 = vsel %vm622_vm3, %v568_v61, %v621_v10 }
 0x26a   : > { %v544_v49 = vpop.permute.xlu0 %543  ;;  %v520_v50 = vpop.permute.xlu1 %519 }
 0x26b   : > { %v604_v62 = vrot.slane %v544_v49, %v1149_v56  ;;  %v572_v63 = vrot.slane %v520_v50, %v1149_v56 }
 0x26d   : > { %v636_v15 = vsel %vm624_vm4, %v604_v62, %v635_v11  ;;  %v625_v17 = vsel %vm624_vm4, %v572_v63, %v623_v14 }
 0x26e   : > { %v547_v51 = vpop.permute.xlu0 %546  ;;  %v523_v52 = vpop.permute.xlu1 %522 }
 0x26f   : > { %v608_v0 = vrot.slane %v547_v51, %v1149_v56  ;;  %v576_v1 = vrot.slane %v523_v52, %v1149_v56 }
 0x271   : > { %v637_v18 = vsel %vm626_vm5, %v608_v0, %v636_v15  ;;  %v627_v20 = vsel %vm626_vm5, %v576_v1, %v625_v17 }
 0x272   : > { %v550_v53 = vpop.permute.xlu0 %549  ;;  %v526_v57 = vpop.permute.xlu1 %525 }
 0x273   : > { %v612_v8 = vrot.slane %v550_v53, %v1149_v56  ;;  %v580_v12 = vrot.slane %v526_v57, %v1149_v56 }
 0x275   : > { %v638_v22 = vsel %vm628_vm6, %v612_v8, %v637_v18  ;;  %v629_v21 = vsel %vm628_vm6, %v580_v12, %v627_v20 }
 0x276   : > { %v553_v2 = vpop.permute.xlu0 %552  ;;  %v529_v9 = vpop.permute.xlu1 %528 }
 0x277   : > { %v616_v13 = vrot.slane %v553_v2, %v1149_v56  ;;  %v584_v16 = vrot.slane %v529_v9, %v1149_v56 }
 0x279   : > { %v639_v26 = vsel %vm630_vm7, %v616_v13, %v638_v22  ;;  %v631_v27 = vsel %vm630_vm7, %v584_v16, %v629_v21 }
 0x27a   : > { %v556_v19 = vpop.permute.xlu0 %555  ;;  %v532_v23 = vpop.permute.xlu1 %531 }
 0x27b   : > { %v620_v24 = vrot.slane %v556_v19, %v1149_v56  ;;  %v588_v25 = vrot.slane %v532_v23, %v1149_v56 }
 0x27d   : > { %v640_v28 = vsel %vm632_vm8, %v620_v24, %v639_v26  ;;  %v633_v29 = vsel %vm632_vm8, %v588_v25, %v631_v27 }
 0x27e   : > { %v647_v30 = vsel %vm643_vm9, %v640_v28, 0.0  ;;  %v644_v31 = vsel %vm643_vm9, %v633_v29, 0.0 }
 0x27f   : > { %648 = vadd.xlane.f32.xlu0 %v647_v30  ;;  %645 = vadd.xlane.f32.xlu1 %v644_v31 }
 0x290   : > { %660 = vbcast.lane.b32.xlu1 %v793_v32, 264 }
 0x295   : > { %656 = vbcast.lane.b32.xlu0 %v793_v32, 256 }
 0x308   : > { %v649_v33 = vpop.xlane.xlu0 %648  ;;  %v646_v34 = vpop.xlane.xlu1 %645 }
 0x30c   : > { %v657_v35 = vpop.permute.xlu0 %656  ;;  %v661_v36 = vpop.permute.xlu1 %660 }
 0x30d   : > { %v664_v37 = vadd.f32 %v657_v35, %v646_v34  ;;  %v665_v56 = vadd.f32 %v661_v36, %v649_v33 }
 0x30f   : > { %v794_v38 = vmul.f32 -1.442695, %v664_v37  ;;  %v795_v39 = vmul.f32 -1.442695, %v665_v56 }
 0x311   : > { %856 = vpow2.f32 %v794_v38 }
 0x312   : > { %858 = vpow2.f32 %v795_v39 }
 0x31e   : > { %v857_v40 = vpop.eup %856 }
 0x31f   : > { %v859_v41 = vpop.eup %858  ;;  %v672_v42 = vadd.f32 1.0, %v857_v40 }
 0x320   : > { %v673_v43 = vadd.f32 1.0, %v859_v41 }
 0x321   : > { %860 = vrcp.f32 %v672_v42 }
 0x322   : > { %862 = vrcp.f32 %v673_v43 }
 0x32e   : > { %v861_v44 = vpop.eup %860 }
 0x32f   : > { %v863_v45 = vpop.eup %862  ;;  %680 = vperm.xlu1 %854, %v861_v44  }
 0x330   : > { %685 = vperm.xlu0 %855, %v863_v45  }
 0x3aa   : > { %v681_v46 = vpop.permute.xlu1 %680 }
 0x3ab   : > { %v688_v47 = vmul.f32 %v681_v46, %v1106_v3  ;;  %v689_v48 = vmul.f32 %v681_v46, %v1108_v4  ;;  %v686_v49 = vpop.permute.xlu0 %685 }
 0x3ac   : > { %v690_v50 = vmul.f32 %v686_v49, %v1110_v5  ;;  %v691_v51 = vmul.f32 %v686_v49, %v1114_v7 }
 0x3ad   : > { %692 = vst [vmem:[%s242_s13] sm:$0xff] %v688_v47  ;;  %693 = vst [vmem:[%s242_s13 + $0x8] sm:$0xff] %v689_v48 }
 0x3ae   : > { %694 = vst [vmem:[%s242_s13 + $0x10] sm:$0xff] %v690_v50  ;;  %695 = vst [vmem:[%s242_s13 + $0x18] sm:$0xff] %v691_v51 }
 0x3af   : > { %905 = shalt.err (!%p902_p10)
}
 0x3b0   : > { %s906_s8 = scalar_lea.hbm %s1194_s29, 512  ;;  %s910_s10 = scalar_lea.hbm %s1244_s5, 1024 }
 0x3b1   : > { %p907_p0 = scmp.ne.s32.totalorder %s1194_s29, %s906_s8  ;;  %p911_p1 = scmp.lt.s32.totalorder %s1194_s29, %s1244_s5 }
 0x3b2   : > { %p912_p3 = scmp.lt.s32.totalorder %s910_s10, %s906_s8 }
 0x3b3   : > { %p908_p2 = pnand %p907_p0, %p1253_p12 }
 0x3b4   : > { %p913_p6 = por %p912_p3, %p911_p1 }
 0x3b5   : > { %p909_p9 = pneg %p908_p2 }
 0x3b7   : > { %p914_p11 = pnand %p913_p6, %p909_p9 }
 0x3b9   : > { %917 = shalt.err (!%p914_p11)
}
 0x3ba   : > { %s963_s26 = smov 256   ;;  %s964_s28 = smov 16  }
 0x3bb   : > { %805 = dma.vmem_to_hbm [thread:$0]  (%p1253_p12), %s1187_s17, 512, %s1194_s29, %s697_s22, %s963_s26, %s963_s26, %s964_s28  }
 0x3bc PF: > { %s725_s12 = sand.u32 1, %s944_s18   ;;  %p1254_p13 = scmp.ne.s32.totalorder %s1250_s6, 0 }
 0x3bd   : > { %p1255_p4 = scmp.ge.s32.totalorder %s956_s21, 2  ;;  %s726_s25 = scalar_lea.sflag [#allocation4], %s725_s12 }
 0x3bf   : > { %p812_p5 = pnand %p1255_p4, %p1254_p13 }
 0x3c1   : > { %p813_p7 = pneg %p812_p5 }
 0x3c3   : > { %939 = dma.done.wait (%p813_p7), %s726_s25, 512  }
 0x3c4   : > { %941 = vsyncadd (%p813_p7), %s726_s25, 4294966784  ;;  %p18_p8 = scmp.ge.s32.totalorder %s1020_s24, 4   ;;  %s1256_s18 = smov %s948_s19 }
 0x3c5   : > { %s1257_s19 = smov %s952_s20  ;;  %s1258_s20 = smov %s1032_s27 }
 0x3c6   : > { %s1259_s21 = smov %s1020_s24  ;;  %20 = sbr.rel (!%p18_p8) target bundleno = 5 (0x5), region = 85 }
 0x3cb   :  { %731 = vsyncpa [#allocation3], 1 }
 0x3cc   :  { %733 = vsyncpa [#allocation3 + $0x1], 1 }
 0x3cd   :  { %734 = vsyncpa [#allocation4], 1 }
 0x3ce   :  { %736 = vsyncpa [#allocation4 + $0x1], 1 }

</bundles_post_ra>
